<compile_context>
chip_gen: v7x
topology: tpu7x:2x2x1
jax: 0.10.0
libtpu: 0.0.40
codegen_flags: <defaults>
</compile_context>

<pallas_src>
import functools

import jax
import jax.numpy as jnp
from jax import lax
from jax.experimental import pallas as pl
from jax.experimental.pallas import tpu as pltpu


def _ce2_kernel(x_ref, w_ref, bd_ref, y_ref, part_ref, acc_ref,
                *, batch_size, block_rows, steps_per_split, pack):
    """Fused packed-Linear + 2-class cross-entropy partial-sum kernel.

    x_ref    : [TBp, pack*D] src dtype (VMEM)       -- `pack` examples per row
    w_ref    : [pack*D, pack] f32 (VMEM, resident)  -- block-diag (w1 - w0)
    bd_ref   : [1, 1]        f32 (VMEM, resident)   -- b1 - b0
    y_ref    : [TBp, pack]   i32 (VMEM)             -- integer class labels
    part_ref : [8, 128]      f32 (VMEM)             -- per-split partial sum
    acc_ref  : [1, 1]        f32 (VMEM scratch)     -- running loss sum
    """
    i = pl.program_id(1)

    @pl.when(i == 0)
    def _():
        acc_ref[...] = jnp.zeros_like(acc_ref)

    # Cast per-tile (input stays in its source dtype in HBM).
    x = x_ref[...].astype(jnp.float32)                       # [TBp, pack*D]
    # One MXU matmul gives z = l1 - l0 for all `pack` examples of each row.
    z = jnp.dot(x, w_ref[...], preferred_element_type=jnp.float32)  # [TBp,pack]
    z = z + bd_ref[...]                                      # (1,1) broadcast

    # Closed-form 2-class CE: CE = softplus((1-2y) * z), stable form.
    s = (1 - 2 * y_ref[...]).astype(jnp.float32)             # +1 for y=0, -1 for y=1
    t = s * z
    per_ex = jnp.maximum(t, 0.0) + jnp.log(1.0 + jnp.exp(-jnp.abs(t)))

    # Mask ragged-tail / host-padded examples BEFORE accumulating.
    block_id = pl.program_id(0) * steps_per_split + i
    row = lax.broadcasted_iota(jnp.int32, per_ex.shape, 0)
    col = lax.broadcasted_iota(jnp.int32, per_ex.shape, 1)
    ex_id = (block_id * block_rows + row) * pack + col
    per_ex = jnp.where(ex_id < batch_size, per_ex, 0.0)

    acc_ref[...] += jnp.sum(per_ex, keepdims=True)           # [1, 1]

    @pl.when(i == pl.num_programs(1) - 1)
    def _():
        part_ref[...] = jnp.broadcast_to(acc_ref[...], (8, 128))


def _pick_block_rows(packed_rows):
    """Packed-row tile size (1 packed row = 4 examples for D=32).

    VMEM per grid step (double-buffered streams), with lane padding included:
      x tile : (TBp, 128) f32 -> TBp * 512 B per buffer (lane-dense)
      y tile : (TBp, 4) i32, lane-padded to 128 lanes -> TBp * 512 B per buffer
               (HBM traffic for labels is still only 4 B/example; only the
                VMEM tile is padded)
    => ~2 KiB * TBp total.  TBp = 4096 (16384 examples/step) ~= 8 MiB, inside
    the 32 MiB scoped VMEM requested below on every generation (v5e's default
    scoped budget is only 16 MiB, hence the explicit vmem_limit_bytes).
    16384 examples/step amortizes the ~0.35 us/step pipeline overhead:
    ~2 MiB of f32 x per step ~= 2.5 us HBM on v5e, ~0.7 us on v7x.
    """
    return min(packed_rows, 4096)


def correctness_worker_loss(x, y, weight, bias):
    """x: [B, D] (f32/bf16), y: [B] int labels in {0,1},
    weight: [2, D], bias: [2].
    Returns scalar f32 mean cross-entropy == CorrectnessWorkerM.forward(batch).
    """
    B, D = x.shape
    C = weight.shape[0]
    assert C == 2, "CorrectnessWorkerM wraps nn.Linear(32, 2): 2 classes"

    # Lane-dense packing factor: 4 examples per 128-lane row for D=32.
    pack = 128 // D if (D <= 128 and 128 % D == 0) else 1

    y = y.astype(jnp.int32)
    if B % pack != 0:
        # Rare ragged case: pad to a whole packed row; padded examples are
        # masked out in-kernel (ex_id < B) before accumulation.
        padn = pack - (B % pack)
        x = jnp.pad(x, ((0, padn), (0, 0)))
        y = jnp.pad(y, ((0, padn),))

    # Free contiguous reshapes; x keeps its source dtype (cast happens
    # per-tile inside the kernel — no extra wrapper pass over HBM).
    x_pack = x.reshape(-1, pack * D)                 # [Bp, pack*D]
    y_pack = y.reshape(-1, pack)                     # [Bp, pack]
    bp = x_pack.shape[0]

    # 2-class CE only needs z = x.(w1 - w0) + (b1 - b0): build a block-diagonal
    # [pack*D, pack] weight so one matmul produces z for all packed examples.
    wd = (weight[1] - weight[0]).astype(jnp.float32)                 # [D]
    eye = jnp.eye(pack, dtype=jnp.float32)                           # [pack,pack]
    w_pack = (eye[:, None, :] * wd[None, :, None]).reshape(pack * D, pack)
    bd = (bias[1] - bias[0]).reshape(1, 1).astype(jnp.float32)       # [1, 1]

    tbp = _pick_block_rows(bp)
    total_blocks = pl.cdiv(bp, tbp)

    # Leading "parallel" axis: on v7x both TensorCores take half the batch
    # range; on v5e/v6e (1 TC) it just iterates serially with the same total
    # step count.  Only split when it divides evenly so every block index
    # stays in range (no clamping needed).
    nsplit = 2 if (total_blocks >= 2 and total_blocks % 2 == 0) else 1
    steps = total_blocks // nsplit

    kernel = functools.partial(
        _ce2_kernel, batch_size=B, block_rows=tbp,
        steps_per_split=steps, pack=pack)

    partial = pl.pallas_call(
        kernel,
        out_shape=jax.ShapeDtypeStruct((nsplit * 8, 128), jnp.float32),
        grid=(nsplit, steps),
        in_specs=[
            pl.BlockSpec((tbp, pack * D), lambda c, i: (c * steps + i, 0)),  # x
            pl.BlockSpec((pack * D, pack), lambda c, i: (0, 0)),             # w (resident)
            pl.BlockSpec((1, 1), lambda c, i: (0, 0)),                       # b1-b0 (resident)
            pl.BlockSpec((tbp, pack), lambda c, i: (c * steps + i, 0)),      # labels
        ],
        out_specs=pl.BlockSpec((8, 128), lambda c, i: (c, 0)),
        scratch_shapes=[pltpu.VMEM((1, 1), jnp.float32)],
        compiler_params=pltpu.CompilerParams(
            dimension_semantics=("parallel", "arbitrary"),
            vmem_limit_bytes=32 * 1024 * 1024,   # v5e default (16 MiB) is too small
        ),
    )(x_pack, w_pack, bd, y_pack)

    # Each split wrote its partial sum broadcast over its (8,128) block.
    return jnp.sum(partial[::8, 0]) / B


def _reference_loss(x, y, weight, bias):
    logits = x.astype(jnp.float32) @ weight.T + bias
    logp = jax.nn.log_softmax(logits, axis=-1)
    return -jnp.mean(jnp.take_along_axis(logp, y[:, None], axis=-1))


if __name__ == "__main__":
    # Small shapes consistent with the underlying model: Linear(32, 2).
    B, D, C = 8, 32, 2

    key = jax.random.PRNGKey(0)
    kx, ky, kw, kb = jax.random.split(key, 4)

    x = jax.random.normal(kx, (B, D), dtype=jnp.float32)
    y = jax.random.randint(ky, (B,), 0, C, dtype=jnp.int32)

    # Deterministic parameter init (Kaiming-uniform-ish bound like nn.Linear).
    bound = 1.0 / (D ** 0.5)
    weight = jax.random.uniform(kw, (C, D), jnp.float32, -bound, bound)
    bias = jax.random.uniform(kb, (C,), jnp.float32, -bound, bound)

    loss = correctness_worker_loss(x, y, weight, bias)
    jax.block_until_ready(loss)

    ref = _reference_loss(x, y, weight, bias)
    assert jnp.allclose(loss, ref, atol=1e-5, rtol=1e-5), (loss, ref)

    print("KERNEL_OK")
</pallas_src>

<mosaic_0001>
module attributes {stable_mosaic.version = 11 : i64} {
  func.func @_ce2_kernel(%arg0: i32, %arg1: i32, %arg2: memref<2x128xf32, #tpu.memory_space<vmem>>, %arg3: memref<128x4xf32, #tpu.memory_space<vmem>>, %arg4: memref<1x1xf32, #tpu.memory_space<vmem>>, %arg5: memref<2x4xi32, #tpu.memory_space<vmem>>, %arg6: memref<8x128xf32, #tpu.memory_space<vmem>>, %arg7: memref<1x1xf32, #tpu.memory_space<vmem>>) attributes {dimension_semantics = [#tpu.dimension_semantics<parallel>, #tpu.dimension_semantics<arbitrary>], iteration_bounds = array<i64: 1, 1>, scalar_prefetch = 0 : i64, scratch_operands = 1 : i64, tpu.core_type = #tpu.core_type<tc>, window_params = [{transform_indices = @transform_0, window_bounds = array<i64: 2, 128>}, {pipeline_mode = #tpu.pipeline_mode<synchronous>, transform_indices = @transform_1, window_bounds = array<i64: 128, 4>}, {pipeline_mode = #tpu.pipeline_mode<synchronous>, transform_indices = @transform_2, window_bounds = array<i64: 1, 1>}, {transform_indices = @transform_3, window_bounds = array<i64: 2, 4>}, {transform_indices = @transform_4, window_bounds = array<i64: 8, 128>}]} {
    %c0_i32 = arith.constant 0 : i32
    %0 = arith.cmpi eq, %arg1, %c0_i32 : i32
    %1 = arith.extui %0 : i1 to i32
    %c0_i32_0 = arith.constant 0 : i32
    %2 = arith.cmpi ne, %1, %c0_i32_0 : i32
    scf.if %2 {
      %cst_21 = arith.constant 0.000000e+00 : f32
      %51 = vector.broadcast %cst_21 : f32 to vector<1x1xf32>
      %c0_22 = arith.constant 0 : index
      %c0_23 = arith.constant 0 : index
      %52 = vector.load %arg7[%c0_22, %c0_23] : memref<1x1xf32, #tpu.memory_space<vmem>>, vector<1x1xf32>
      tpu.vector_store %arg7[%c0_22, %c0_23], %51 {strides = array<i32>} : memref<1x1xf32, #tpu.memory_space<vmem>>, vector<1x1xf32>,
    } else {
    }
    %c0 = arith.constant 0 : index
    %c0_1 = arith.constant 0 : index
    %3 = vector.load %arg2[%c0, %c0_1] : memref<2x128xf32, #tpu.memory_space<vmem>>, vector<2x128xf32>
    %c0_2 = arith.constant 0 : index
    %c0_3 = arith.constant 0 : index
    %4 = vector.load %arg3[%c0_2, %c0_3] : memref<128x4xf32, #tpu.memory_space<vmem>>, vector<128x4xf32>
    %cst = arith.constant dense<0.000000e+00> : vector<2x4xf32>
    %5 = tpu.matmul %3, %4, %cst {dimension_numbers = #tpu.dot_dimension_numbers<[1], [0], [0], [1], [0, 0, 1, 1], [], []>} : vector<2x128xf32>, vector<128x4xf32>, vector<2x4xf32> -> vector<2x4xf32>
    %c0_4 = arith.constant 0 : index
    %c0_5 = arith.constant 0 : index
    %6 = vector.load %arg4[%c0_4, %c0_5] : memref<1x1xf32, #tpu.memory_space<vmem>>, vector<1x1xf32>
    %7 = vector.broadcast %6 : vector<1x1xf32> to vector<2x4xf32>
    %8 = arith.addf %5, %7 : vector<2x4xf32>
    %c0_6 = arith.constant 0 : index
    %c0_7 = arith.constant 0 : index
    %9 = vector.load %arg5[%c0_6, %c0_7] : memref<2x4xi32, #tpu.memory_space<vmem>>, vector<2x4xi32>
    %c2_i32 = arith.constant 2 : i32
    %10 = vector.broadcast %c2_i32 : i32 to vector<2x4xi32>
    %11 = arith.muli %10, %9 : vector<2x4xi32>
    %c1_i32 = arith.constant 1 : i32
    %12 = vector.broadcast %c1_i32 : i32 to vector<2x4xi32>
    %13 = arith.subi %12, %11 : vector<2x4xi32>
    %14 = arith.sitofp %13 : vector<2x4xi32> to vector<2x4xf32>
    %15 = arith.mulf %14, %8 : vector<2x4xf32>
    %cst_8 = arith.constant 0.000000e+00 : f32
    %16 = vector.broadcast %cst_8 : f32 to vector<2x4xf32>
    %17 = arith.maximumf %15, %16 : vector<2x4xf32>
    %18 = math.absf %15 : vector<2x4xf32>
    %cst_9 = arith.constant 0.000000e+00 : f32
    %19 = vector.broadcast %cst_9 : f32 to vector<2x4xf32>
    %20 = arith.subf %19, %18 : vector<2x4xf32>
    %21 = math.exp %20 : vector<2x4xf32>
    %cst_10 = arith.constant 1.000000e+00 : f32
    %22 = vector.broadcast %cst_10 : f32 to vector<2x4xf32>
    %23 = arith.addf %22, %21 : vector<2x4xf32>
    %24 = math.log %23 : vector<2x4xf32>
    %25 = arith.addf %17, %24 : vector<2x4xf32>
    %c1_i32_11 = arith.constant 1 : i32
    %26 = arith.muli %arg0, %c1_i32_11 : i32
    %27 = arith.addi %26, %arg1 : i32
    %28 = tpu.iota {dimensions = array<i32: 0>} : vector<2x4xi32>
    %29 = tpu.iota {dimensions = array<i32: 1>} : vector<2x4xi32>
    %c2_i32_12 = arith.constant 2 : i32
    %30 = arith.muli %27, %c2_i32_12 : i32
    %31 = vector.broadcast %30 : i32 to vector<2x4xi32>
    %32 = arith.addi %31, %28 : vector<2x4xi32>
    %c4_i32 = arith.constant 4 : i32
    %33 = vector.broadcast %c4_i32 : i32 to vector<2x4xi32>
    %34 = arith.muli %32, %33 : vector<2x4xi32>
    %35 = arith.addi %34, %29 : vector<2x4xi32>
    %c8_i32 = arith.constant 8 : i32
    %36 = vector.broadcast %c8_i32 : i32 to vector<2x4xi32>
    %37 = arith.cmpi slt, %35, %36 : vector<2x4xi32>
    %cst_13 = arith.constant 0.000000e+00 : f32
    %38 = vector.broadcast %cst_13 : f32 to vector<2x4xf32>
    %39 = arith.select %37, %25, %38 : vector<2x4xi1>, vector<2x4xf32>
    %c0_14 = arith.constant 0 : index
    %c0_15 = arith.constant 0 : index
    %40 = vector.load %arg7[%c0_14, %c0_15] : memref<1x1xf32, #tpu.memory_space<vmem>>, vector<1x1xf32>
    %41 = vector.shape_cast %39 : vector<2x4xf32> to vector<1x2x4xf32>
    %cst_16 = arith.constant dense<0.000000e+00> : vector<1xf32>
    %42 = vector.multi_reduction <add>, %41, %cst_16 [1, 2] : vector<1x2x4xf32> to vector<1xf32>
    %43 = vector.shape_cast %42 : vector<1xf32> to vector<1x1x1xf32>
    %44 = vector.extract %43[0, 0, 0] : f32 from vector<1x1x1xf32>
    %45 = vector.broadcast %44 : f32 to vector<1x1xf32>
    %46 = arith.addf %40, %45 : vector<1x1xf32>
    %c0_17 = arith.constant 0 : index
    %c0_18 = arith.constant 0 : index
    %47 = vector.load %arg7[%c0_17, %c0_18] : memref<1x1xf32, #tpu.memory_space<vmem>>, vector<1x1xf32>
    tpu.vector_store %arg7[%c0_17, %c0_18], %46 {strides = array<i32>} : memref<1x1xf32, #tpu.memory_space<vmem>>, vector<1x1xf32>,
    %c0_i32_19 = arith.constant 0 : i32
    %48 = arith.cmpi eq, %arg1, %c0_i32_19 : i32
    %49 = arith.extui %48 : i1 to i32
    %c0_i32_20 = arith.constant 0 : i32
    %50 = arith.cmpi ne, %49, %c0_i32_20 : i32
    scf.if %50 {
      %c0_21 = arith.constant 0 : index
      %c0_22 = arith.constant 0 : index
      %51 = vector.load %arg7[%c0_21, %c0_22] : memref<1x1xf32, #tpu.memory_space<vmem>>, vector<1x1xf32>
      %52 = vector.shape_cast %51 : vector<1x1xf32> to vector<1x1xf32>
      %53 = vector.broadcast %52 : vector<1x1xf32> to vector<8x128xf32>
      %c0_23 = arith.constant 0 : index
      %c0_24 = arith.constant 0 : index
      %54 = vector.load %arg6[%c0_23, %c0_24] : memref<8x128xf32, #tpu.memory_space<vmem>>, vector<8x128xf32>
      tpu.vector_store %arg6[%c0_23, %c0_24], %53 {strides = array<i32>} : memref<8x128xf32, #tpu.memory_space<vmem>>, vector<8x128xf32>,
    } else {
    }
    return
  }
  func.func @transform_0(%arg0: i32, %arg1: i32) -> (i32, i32) {
    %c1_i32 = arith.constant 1 : i32
    %0 = arith.muli %arg0, %c1_i32 : i32
    %1 = arith.addi %0, %arg1 : i32
    %c0_i32 = arith.constant 0 : i32
    %c0_i32_0 = arith.constant 0 : i32
    return %1, %c0_i32 : i32, i32
  }
  func.func @transform_1(%arg0: i32, %arg1: i32) -> (i32, i32) {
    %c0_i32 = arith.constant 0 : i32
    %c0_i32_0 = arith.constant 0 : i32
    %c0_i32_1 = arith.constant 0 : i32
    return %c0_i32, %c0_i32_0 : i32, i32
  }
  func.func @transform_2(%arg0: i32, %arg1: i32) -> (i32, i32) {
    %c0_i32 = arith.constant 0 : i32
    %c0_i32_0 = arith.constant 0 : i32
    %c0_i32_1 = arith.constant 0 : i32
    return %c0_i32, %c0_i32_0 : i32, i32
  }
  func.func @transform_3(%arg0: i32, %arg1: i32) -> (i32, i32) {
    %c1_i32 = arith.constant 1 : i32
    %0 = arith.muli %arg0, %c1_i32 : i32
    %1 = arith.addi %0, %arg1 : i32
    %c0_i32 = arith.constant 0 : i32
    %c0_i32_0 = arith.constant 0 : i32
    return %1, %c0_i32 : i32, i32
  }
  func.func @transform_4(%arg0: i32, %arg1: i32) -> (i32, i32) {
    %c0_i32 = arith.constant 0 : i32
    %c0_i32_0 = arith.constant 0 : i32
    return %arg0, %c0_i32 : i32, i32
  }
}

</mosaic_0001>

<bundles_post_ra>
// kernel: tpu_custom_call.1
= control target key start
LH: loop header
LB: loop body
LE: loop exit
PB: predicated region body
PF: predicated region fallthrough
CT: control target
= control target key end

     0   :  { %s455_s0 = inlined_call_operand.vmem [shape: f32[2,128], index: 0, kind: input, shape index: {}]   ;;  %s456_s1 = inlined_call_operand.vmem [shape: f32[128,4], index: 1, kind: input, shape index: {}]   ;;  %s457_s2 = inlined_call_operand.<no memory space> [shape: f32[1,1], index: 2, kind: input, shape index: {}]   ;;  %s458_s3 = inlined_call_operand.vmem [shape: s32[2,4], index: 3, kind: input, shape index: {}]   ;;  %s459_s4 = inlined_call_operand.hbm [shape: f32[8,128], index: 4, kind: output, shape index: {}]  }
   0x1   :  { %v9_v0 = vstv %s457_s2 }
   0x2   :  { %10 = vst [vmem:[#allocation3] sm:$0x1] %v9_v0 }
   0x3   :  { %v61_v1 = vld [vmem:[%s456_s1] sm:$0xff]  ;;  %v62_v2 = vld [vmem:[%s456_s1 + $0x8] sm:$0xff]  ;;  %v63_v3 = vld [vmem:[%s456_s1 + $0x10] sm:$0xff]  ;;  %vm58_vm0 = vcmask 0   ;;  %v354_v4 = vmov 0.0|0.0   ;;  %v355_v7 = vmov 0.0  }
   0x4   :  { %293 = vmatprep.subr.bf16.mxu0 %v354_v4  ;;  %v294_v5 = vpack.c.bf16 %v62_v2, %v61_v1  ;;  %v64_v6 = vld [vmem:[%s456_s1 + $0x18] sm:$0xff]  ;;  %59 = vst.msk [vmem:[#allocation2] sm:$0x1] %vm58_vm0, %v355_v7  ;;  %vm356_vm1 = vmmov 0   ;;  %v357_v8 = vmov 0   ;;  %v65_v10 = vld [vmem:[%s456_s1 + $0x20] sm:$0xff] }
   0x5   :  { %290 = vmatprep.mubr.msk.f32.mxu0 %vm356_vm1, %v355_v7  ;;  %324 = vset.pattern.permute.xlu0 %v357_v8  ;;  %v297_v9 = vpack.c.bf16 %v64_v6, %v63_v3  ;;  %v66_v11 = vld [vmem:[%s456_s1 + $0x28] sm:$0xff] }
   0x6   :  { %295 = vmatpush3.bf16.msra.mxu0 %v294_v5  ;;  %325 = vset.pattern.permute.xlu1 %v357_v8 }
   0x7   :  { %296 = vmatprep.subr.bf16.mxu0 %v354_v4 }
   0x9   :  { %v239_v12 = vld [vmem:[#allocation3] ss:$0 sm:$0xff] }
   0xa   :  { %84 = vperm.xlu0 %324, %v239_v12  }
   0xb   :  { %11 = vsyncpa [#allocation5], 0  ;;  %298 = vmatpush3.bf16.msra.mxu0 %v297_v9  ;;  %v300_v13 = vpack.c.bf16 %v66_v11, %v65_v10  ;;  %v67_v14 = vld [vmem:[%s456_s1 + $0x30] sm:$0xff]  ;;  %v68_v15 = vld [vmem:[%s456_s1 + $0x38] sm:$0xff]  ;;  %v172_v42 = vlaneseq  ;;  %vm184_vm3 = vcmask 25600  }
   0xc   :  { %299 = vmatprep.subr.bf16.mxu0 %v354_v4  ;;  %v303_v16 = vpack.c.bf16 %v68_v15, %v67_v14  ;;  %v69_v17 = vld [vmem:[%s456_s1 + $0x40] sm:$0xff]  ;;  %v70_v18 = vld [vmem:[%s456_s1 + $0x48] sm:$0xff]  ;;  %v71_v20 = vld [vmem:[%s456_s1 + $0x50] sm:$0xff] }
   0xd   :  { %v306_v19 = vpack.c.bf16 %v70_v18, %v69_v17  ;;  %v72_v21 = vld [vmem:[%s456_s1 + $0x58] sm:$0xff]  ;;  %v73_v23 = vld [vmem:[%s456_s1 + $0x60] sm:$0xff]  ;;  %v74_v24 = vld [vmem:[%s456_s1 + $0x68] sm:$0xff]  ;;  %v173_v45 = vshrl.u32 %v172_v42, 7  ;;  %v175_v46 = vand.u32 127, %v172_v42 }
   0xe   :  { %v309_v22 = vpack.c.bf16 %v72_v21, %v71_v20  ;;  %v312_v25 = vpack.c.bf16 %v74_v24, %v73_v23  ;;  %v75_v26 = vld [vmem:[%s456_s1 + $0x70] sm:$0xff]  ;;  %v76_v27 = vld [vmem:[%s456_s1 + $0x78] sm:$0xff]  ;;  %v60_v29 = vld [vmem:[%s455_s0] sm:$0x3]  ;;  %s358_s1 = smov [#allocation4]  }
   0xf   :  { %301 = vmatpush3.bf16.msra.mxu0 %v300_v13  ;;  %v315_v28 = vpack.c.bf16 %v76_v27, %v75_v26  ;;  %v157_v30 = vld [vmem:[%s458_s3] sm:$0x3]  ;;  %v179_v47 = vmul.u32 4, %v173_v45  ;;  %s219_s3 = sshll.u32 %s358_s1, 4  ;;  %s220_s3 = int_to_ptr.vmem [resolvable:$true] %s219_s3 }
  0x10   :  { %302 = vmatprep.subr.bf16.mxu0 %v354_v4  ;;  %v158_v31 = vmul.u32 2, %v157_v30  ;;  %v183_v62 = vld [vmem:[#allocation2] sm:$0x1]  ;;  %s330_s25 = scalar_lea.vmem %s220_s3, 128  ;;  %p335_p1 = scmp.lt.s32.totalorder %s220_s3, %s220_s3 }
  0x11   :  { %v180_v48 = vadd.s32 %v179_v47, %v175_v46  ;;  %p331_p0 = scmp.ne.s32.totalorder %s220_s3, %s330_s25  ;;  %p336_p2 = scmp.lt.s32.totalorder %s330_s25, %s330_s25 }
  0x12   :  { %v159_v32 = vsub.s32 1, %v158_v31 }
  0x13   :  { %304 = vmatpush3.bf16.msra.mxu0 %v303_v16  ;;  %vm181_vm2 = vcmp.lt.s32.totalorder %v180_v48, 8  ;;  %p337_p3 = por %p336_p2, %p335_p1 }
  0x14   :  { %305 = vmatprep.subr.bf16.mxu0 %v354_v4  ;;  %v160_v34 = vcvt.s32.f32 %v159_v32 }
  0x15   :  { %p338_p4 = pnand %p337_p3, %p331_p0 }
  0x17   :  { %307 = vmatpush3.bf16.msra.mxu0 %v306_v19 }
  0x18   :  { %308 = vmatprep.subr.bf16.mxu0 %v354_v4 }
  0x1b   :  { %310 = vmatpush3.bf16.msra.mxu0 %v309_v22 }
  0x1c   :  { %311 = vmatprep.subr.bf16.mxu0 %v354_v4 }
  0x1f   :  { %313 = vmatpush3.bf16.msra.mxu0 %v312_v25 }
  0x20   :  { %314 = vmatprep.subr.bf16.mxu0 %v354_v4 }
  0x23   :  { %316 = vmatpush3.bf16.msra.mxu0 %v315_v28 }
  0x26   :  { %291 = vmatmul.mubr.f32.vlgmr.msra.gmra.mrb[0].mxu0 %v60_v29 }
  0x89   :  { %v85_v33 = vpop.permute.xlu0 %84 }
  0xf9   :  { %v153_v35 = vpop.f32.mrb[0].mxu0 }
  0xfa   :  { %v154_v36 = vadd.f32 %v153_v35, %v85_v33  ;;  %v292_v37 = vpop.f32.mrb[1].mxu0 }
  0xfc   :  { %v161_v38 = vmul.f32 %v160_v34, %v154_v36 }
  0xfe   :  { %v163_v39 = vand.u32 2147483647, %v161_v38  ;;  %v162_v50 = vmax.f32 %v161_v38, 0.0 }
 0x100   :  { %v164_v40 = vsub.f32 0.0, %v163_v39 }
 0x102   :  { %v165_v41 = vmul.f32 1.442695, %v164_v40 }
 0x104   :  { %326 = vpow2.f32 %v165_v41 }
 0x10e   :  { %v327_v43 = vpop.eup %326 }
 0x10f   :  { %v167_v44 = vadd.f32 1.0, %v327_v43 }
 0x111   :  { %328 = vlog2.f32 %v167_v44 }
 0x11b   :  { %v329_v49 = vpop.eup %328 }
 0x11c   :  { %v169_v51 = vmul.f32 0.6931472, %v329_v49 }
 0x11e   :  { %v170_v52 = vadd.f32 %v169_v51, %v162_v50 }
 0x120   :  { %v182_v53 = vsel %vm181_vm2, %v170_v52, 0.0 }
 0x121   :  { %v185_v54 = vsel %vm184_vm3, %v182_v53, 0.0 }
 0x122   :  { %186 = vadd.xlane.f32.xlu0 %v185_v54 }
 0x1af   :  { %v187_v55 = vpop.xlane.xlu0 %186 }
 0x1b0   :  { %v188_v56 = vrot.slane %v187_v55, 4 }
 0x1b2   :  { %v189_v57 = vadd.f32 %v188_v56, %v187_v55 }
 0x1b4   :  { %v190_v58 = vrot.slane %v189_v57, 2 }
 0x1b6   :  { %v191_v59 = vadd.f32 %v190_v58, %v189_v57 }
 0x1b8   :  { %v192_v60 = vrot.slane %v191_v59, 1 }
 0x1ba   :  { %v193_v61 = vadd.f32 %v192_v60, %v191_v59 }
 0x1bc   :  { %317 = vpush %v193_v61 }
 0x1ed   :  { %s318_s0 = spop %317 }
 0x1ee   :  { %v195_v63 = vstv %s318_s0 }
 0x1ef   :  { %v196_v0 = vadd.f32 %v195_v63, %v183_v62 }
 0x1f1   :  { %198 = vst.msk [vmem:[#allocation2] sm:$0x1] %vm58_vm0, %v196_v0 }
 0x1f8   :  { %v240_v1 = vld [vmem:[#allocation2] ss:$0 sm:$0xff] }
 0x1f9   :  { %209 = vperm.xlu1 %325, %v240_v1  }
 0x278   :  { %v210_v2 = vpop.permute.xlu1 %209 }
 0x279   :  { %212 = vst [vmem:[#allocation4] sm:$0xff] %v210_v2 }
 0x27a   :  { %341 = shalt.err (!%p338_p4)
}
 0x27b   :  { %s342_s28 = scalar_lea.hbm %s459_s4, 128 }
 0x27c   :  { %p343_p5 = scmp.ne.s32.totalorder %s459_s4, %s342_s28  ;;  %p346_p6 = scmp.lt.u32.totalorder %s342_s28, %s459_s4 }
 0x27e   :  { %p348_p7 = pnand %p346_p6, %p343_p5 }
 0x280   :  { %351 = shalt.err (!%p348_p7)
}
 0x281   :  { %222 = dma.vmem_to_hbm [thread:$0]  %s220_s3, 128, %s459_s4, [#allocation5]  }
 0x282   :  { %352 = dma.done.wait [#allocation5], 128  }
 0x283   :  { %353 = vsyncadd [#allocation5], 4294967168 }
 0x284   :  { %226 = vsyncpa [#allocation5], 1 }

</bundles_post_ra>
